<compile_context>
chip_gen: v7x
topology: tpu7x:2x2x1
jax: 0.10.0
libtpu: 0.0.40
codegen_flags: <defaults>
</compile_context>

<pallas_src>
import functools

import numpy as np
import jax
import jax.numpy as jnp
from jax import lax
from jax.experimental import pallas as pl
from jax.experimental.pallas import tpu as pltpu


def _mix_coeffs(alpha, theta):
    """Static 2x2 real mixing coefficients for out = beta1*x + beta2*conj(x)."""
    a = 10.0 ** (float(alpha) / 10.0) - 1.0
    th = float(np.deg2rad(float(theta)))
    mu = np.cos(th / 2.0) + 1j * a * np.sin(th / 2.0)
    nu = a * np.cos(th / 2.0) - 1j * np.sin(th / 2.0)
    term = abs(mu) ** 2 - abs(nu) ** 2
    beta1 = np.conj(mu) / term
    beta2 = -nu / term
    c_rr = float(beta1.real + beta2.real)
    c_ri = float(-beta1.imag + beta2.imag)
    c_ir = float(beta1.imag + beta2.imag)
    c_ii = float(beta1.real - beta2.real)
    return c_rr, c_ri, c_ir, c_ii


def _make_kernel(c_rr, c_ri, c_ir, c_ii):
    """Elementwise 2x2-mix kernel on a stacked (2, TM, W) f32 block."""
    def kernel(x_ref, o_ref):
        xr = x_ref[0, :, :]
        xi = x_ref[1, :, :]
        o_ref[0, :, :] = c_rr * xr + c_ri * xi
        o_ref[1, :, :] = c_ir * xr + c_ii * xi
    return kernel


def _pick_tm(rows):
    """Largest row-tile that keeps >= 8 grid steps (>= 4 per v7x core)."""
    for cand in (512, 256, 128, 64, 32, 16, 8):
        if rows >= 8 * cand:
            return cand
    return rows  # small input: single full-array block


def _iq_pallas(xs, coeffs, tm):
    """xs: (2, Rp, W) float32 with Rp % tm == 0 (or tm == Rp). One HBM pass."""
    _, rp, w = xs.shape
    n = rp * w
    kernel = _make_kernel(*coeffs)
    blk = pl.BlockSpec((2, tm, w), lambda i: (0, i, 0))
    return pl.pallas_call(
        kernel,
        out_shape=jax.ShapeDtypeStruct((2, rp, w), jnp.float32),
        grid_spec=pltpu.PrefetchScalarGridSpec(
            num_scalar_prefetch=0,
            grid=(rp // tm,),
            in_specs=[blk],
            out_specs=blk,
        ),
        compiler_params=pltpu.CompilerParams(
            dimension_semantics=("parallel",),
            vmem_limit_bytes=32 * 1024 * 1024,
        ),
        input_output_aliases={0: 0},
        cost_estimate=pl.CostEstimate(
            flops=6 * n, transcendentals=0, bytes_accessed=16 * n),
    )(xs)


def iq_imbalance_compensation_planar(xs, alpha=1.0, theta=2.0):
    """Preferred boundary: xs is planar (2, R, W) float32 (real, imag planes).

    The Pallas kernel is the only HBM pass. R should ideally be a multiple of
    8 and W a multiple of 128 (or use the whole array as one block).
    """
    coeffs = _mix_coeffs(alpha, theta)
    _, r, _ = xs.shape
    tm = r
    for cand in (512, 256, 128, 64, 32, 16, 8):
        if r >= 8 * cand and r % cand == 0:
            tm = cand
            break
    return _iq_pallas(xs, coeffs, tm)


@functools.partial(jax.jit, static_argnames=("alpha", "theta"))
def iq_imbalance_compensation(x, alpha=1.0, theta=2.0):
    """Complex boundary (mirrors the PyTorch forward): complex in, complex64 out."""
    coeffs = _mix_coeffs(alpha, theta)

    orig_shape = x.shape
    n = int(np.prod(orig_shape)) if len(orig_shape) else 1

    # ---- layout: lane-dense slab, >= 8 grid steps before growing TM ----
    w = 1024 if n >= 1024 else 128          # lane-dense last dim (mult. of 128)
    rows = -(-n // w)                       # ceil-div
    tm = _pick_tm(rows)
    rows_padded = -(-rows // tm) * tm
    pad = rows_padded * w - n

    # Pad the flat *complex* array (fuses with the real/imag/stack producer
    # fusion below -> no extra HBM pass), then build one stacked f32 slab.
    xf = x.reshape(-1)
    if pad:
        xf = jnp.pad(xf, (0, pad))
    xs = jnp.stack([jnp.real(xf), jnp.imag(xf)]).astype(jnp.float32)
    xs = xs.reshape(2, rows_padded, w)

    out_s = _iq_pallas(xs, coeffs, tm)

    out = lax.complex(out_s[0].reshape(-1)[:n], out_s[1].reshape(-1)[:n])
    return out.reshape(orig_shape)


if __name__ == "__main__":
    key = jax.random.PRNGKey(0)
    k1, k2 = jax.random.split(key)
    shape = (2, 4, 16, 16)  # small NCHW example
    xr = jax.random.normal(k1, shape, dtype=jnp.float32)
    xi = jax.random.normal(k2, shape, dtype=jnp.float32)
    x = (xr + 1j * xi).astype(jnp.complex64)

    out = iq_imbalance_compensation(x, alpha=1.0, theta=2.0)
    out = jax.block_until_ready(out)

    # reference (pure JAX, mirrors the PyTorch forward)
    a = jnp.float32(10.0 ** (1.0 / 10.0) - 1.0)
    th = jnp.float32(np.deg2rad(2.0))
    mu = jnp.cos(th / 2) + 1j * a * jnp.sin(th / 2)
    nu = a * jnp.cos(th / 2) - 1j * jnp.sin(th / 2)
    term = jnp.abs(mu) ** 2 - jnp.abs(nu) ** 2
    beta1 = jnp.conj(mu) / term
    beta2 = -nu / term
    ref = beta1 * x + beta2 * jnp.conj(x)

    np.testing.assert_allclose(np.asarray(out), np.asarray(ref),
                               rtol=1e-5, atol=1e-5)
    assert out.shape == shape and out.dtype == jnp.complex64
    print("KERNEL_OK")
</pallas_src>

<mosaic_0001>
module attributes {stable_mosaic.version = 11 : i64} {
  func.func @kernel(%arg0: i32, %arg1: memref<2x2x1024xf32, #tpu.memory_space<vmem>>, %arg2: memref<2x2x1024xf32, #tpu.memory_space<vmem>>) attributes {dimension_semantics = [#tpu.dimension_semantics<parallel>], iteration_bounds = array<i64: 1>, scalar_prefetch = 0 : i64, scratch_operands = 0 : i64, tpu.core_type = #tpu.core_type<tc>, window_params = [{transform_indices = @transform_0, window_bounds = array<i64: 2, 2, 1024>}, {transform_indices = @transform_1, window_bounds = array<i64: 2, 2, 1024>}]} {
    %c0 = arith.constant 0 : index
    %c0_0 = arith.constant 0 : index
    %c0_1 = arith.constant 0 : index
    %0 = vector.load %arg1[%c0, %c0_0, %c0_1] : memref<2x2x1024xf32, #tpu.memory_space<vmem>>, vector<1x2x1024xf32>
    %1 = vector.shape_cast %0 : vector<1x2x1024xf32> to vector<2x1024xf32>
    %c1 = arith.constant 1 : index
    %c0_2 = arith.constant 0 : index
    %c0_3 = arith.constant 0 : index
    %2 = vector.load %arg1[%c1, %c0_2, %c0_3] : memref<2x2x1024xf32, #tpu.memory_space<vmem>>, vector<1x2x1024xf32>
    %3 = vector.shape_cast %2 : vector<1x2x1024xf32> to vector<2x1024xf32>
    %cst = arith.constant 0.794691383 : f32
    %4 = vector.broadcast %cst : f32 to vector<2x1024xf32>
    %5 = arith.mulf %4, %1 : vector<2x1024xf32>
    %cst_4 = arith.constant 0.0235644896 : f32
    %6 = vector.broadcast %cst_4 : f32 to vector<2x1024xf32>
    %7 = arith.mulf %6, %3 : vector<2x1024xf32>
    %8 = arith.addf %5, %7 : vector<2x1024xf32>
    %c0_5 = arith.constant 0 : index
    %c0_6 = arith.constant 0 : index
    %c0_7 = arith.constant 0 : index
    %9 = vector.load %arg2[%c0_5, %c0_6, %c0_7] : memref<2x2x1024xf32, #tpu.memory_space<vmem>>, vector<1x2x1024xf32>
    %10 = vector.shape_cast %9 : vector<1x2x1024xf32> to vector<2x1024xf32>
    %11 = vector.shape_cast %8 : vector<2x1024xf32> to vector<1x2x1024xf32>
    tpu.vector_store %arg2[%c0_5, %c0_6, %c0_7], %11 {strides = array<i32>} : memref<2x2x1024xf32, #tpu.memory_space<vmem>>, vector<1x2x1024xf32>,
    %cst_8 = arith.constant 0.0138713894 : f32
    %12 = vector.broadcast %cst_8 : f32 to vector<2x1024xf32>
    %13 = arith.mulf %12, %1 : vector<2x1024xf32>
    %cst_9 = arith.constant 1.35000873 : f32
    %14 = vector.broadcast %cst_9 : f32 to vector<2x1024xf32>
    %15 = arith.mulf %14, %3 : vector<2x1024xf32>
    %16 = arith.addf %13, %15 : vector<2x1024xf32>
    %c1_10 = arith.constant 1 : index
    %c0_11 = arith.constant 0 : index
    %c0_12 = arith.constant 0 : index
    %17 = vector.load %arg2[%c1_10, %c0_11, %c0_12] : memref<2x2x1024xf32, #tpu.memory_space<vmem>>, vector<1x2x1024xf32>
    %18 = vector.shape_cast %17 : vector<1x2x1024xf32> to vector<2x1024xf32>
    %19 = vector.shape_cast %16 : vector<2x1024xf32> to vector<1x2x1024xf32>
    tpu.vector_store %arg2[%c1_10, %c0_11, %c0_12], %19 {strides = array<i32>} : memref<2x2x1024xf32, #tpu.memory_space<vmem>>, vector<1x2x1024xf32>,
    return
  }
  func.func @transform_0(%arg0: i32) -> (i32, i32, i32) {
    %c0_i32 = arith.constant 0 : i32
    %c0_i32_0 = arith.constant 0 : i32
    %c0_i32_1 = arith.constant 0 : i32
    return %c0_i32, %arg0, %c0_i32_0 : i32, i32, i32
  }
  func.func @transform_1(%arg0: i32) -> (i32, i32, i32) {
    %c0_i32 = arith.constant 0 : i32
    %c0_i32_0 = arith.constant 0 : i32
    %c0_i32_1 = arith.constant 0 : i32
    return %c0_i32, %arg0, %c0_i32_0 : i32, i32, i32
  }
}

</mosaic_0001>

<bundles_post_ra>
// kernel: custom-call
= control target key start
LH: loop header
LB: loop body
LE: loop exit
PB: predicated region body
PF: predicated region fallthrough
CT: control target
= control target key end

     0   :  { %2 = vsyncpa [#allocation0], 0  ;;  %s61_s0 = inlined_call_operand.hbm [shape: c64[2,4,16,16], index: 0, kind: input, shape index: {}]   ;;  %s62_s1 = inlined_call_operand.vmem [shape: f32[2,4,16,16], index: 1, kind: output, shape index: {}]  }
   0x1   :  { %s3_s8 = sshll.u32 %s62_s1, 4  ;;  %s9_s11 = scalar_lea.hbm %s61_s0, 2048  ;;  %s4_s8 = int_to_ptr.vmem [resolvable:$true] %s3_s8 }
   0x2   :  { %p10_p0 = scmp.ne.s32.totalorder %s61_s0, %s9_s11  ;;  %s11_s16 = scalar_lea.hbm %s61_s0, 4096 }
   0x3   :  { %p12_p1 = scmp.lt.u32.totalorder %s11_s16, %s9_s11  ;;  %p13_p2 = scmp.lt.u32.totalorder %s9_s11, %s61_s0 }
   0x5   :  { %p14_p3 = por %p13_p2, %p12_p1 }
   0x7   :  { %p15_p4 = pnand %p14_p3, %p10_p0 }
   0x9   :  { %18 = shalt.err (!%p15_p4)  }
   0xa   :  { %s19_s1 = scalar_lea.vmem %s4_s8, 2048  ;;  %p24_p6 = scmp.lt.s32.totalorder %s4_s8, %s4_s8 }
   0xb   :  { %p20_p5 = scmp.ne.s32.totalorder %s4_s8, %s19_s1  ;;  %p25_p7 = scmp.lt.s32.totalorder %s19_s1, %s19_s1 }
   0xd   :  { %p26_p8 = por %p25_p7, %p24_p6 }
   0xf   :  { %p27_p9 = pnand %p26_p8, %p20_p5 }
  0x11   :  { %30 = shalt.err (!%p27_p9)  }
  0x12   :  { %6 = dma.hbm_to_vmem [thread:$0]  %s61_s0, 2048, %s4_s8, [#allocation0] }
  0x13   :  { %31 = dma.done.wait [#allocation0], 2048  }
  0x14   :  { %32 = vsyncadd [#allocation0], 4294965248 }
  0x15   :  { %8 = vsyncpa [#allocation0], 1 }

// kernel: custom-call.1
= control target key start
LH: loop header
LB: loop body
LE: loop exit
PB: predicated region body
PF: predicated region fallthrough
CT: control target
= control target key end

     0   :  { %s59_s0 = inlined_call_operand.hbm [shape: c64[2,4,16,16], index: 0, kind: input, shape index: {}]   ;;  %s60_s1 = inlined_call_operand.vmem [shape: f32[2,4,16,16], index: 1, kind: output, shape index: {}]  }
   0x1   :  { %s2_s8 = scalar_lea.hbm %s59_s0, 2048 }
   0x2   :  { %3 = vsyncpa [#allocation0], 0  ;;  %s4_s11 = sshll.u32 %s60_s1, 4  ;;  %s34_s14 = scalar_lea.hbm %s59_s0, 4096  ;;  %s5_s11 = int_to_ptr.vmem [resolvable:$true] %s4_s11 }
   0x3   :  { %p11_p0 = scmp.ne.s32.totalorder %s2_s8, %s34_s14  ;;  %p13_p1 = scmp.lt.u32.totalorder %s2_s8, %s59_s0 }
   0x4   :  { %p14_p2 = scmp.lt.u32.totalorder %s34_s14, %s34_s14  ;;  %p16_p4 = scmp.lt.u32.totalorder %s34_s14, %s2_s8 }
   0x6   :  { %p15_p3 = por %p14_p2, %p13_p1 }
   0x8   :  { %p17_p5 = por %p16_p4, %p15_p3 }
   0xa   :  { %p18_p6 = pnand %p17_p5, %p11_p0 }
   0xc   :  { %21 = shalt.err (!%p18_p6)  }
   0xd   :  { %s22_s17 = scalar_lea.vmem %s5_s11, 2048  ;;  %p27_p8 = scmp.lt.s32.totalorder %s5_s11, %s5_s11 }
   0xe   :  { %p23_p7 = scmp.ne.s32.totalorder %s5_s11, %s22_s17  ;;  %p28_p9 = scmp.lt.s32.totalorder %s22_s17, %s22_s17 }
  0x10   :  { %p29_p10 = por %p28_p9, %p27_p8 }
  0x12   :  { %p30_p11 = pnand %p29_p10, %p23_p7 }
  0x14   :  { %33 = shalt.err (!%p30_p11)  }
  0x15   :  { %7 = dma.hbm_to_vmem [thread:$0]  %s2_s8, 2048, %s5_s11, [#allocation0] }
  0x16   :  { %35 = dma.done.wait [#allocation0], 2048  }
  0x17   :  { %36 = vsyncadd [#allocation0], 4294965248 }
  0x18   :  { %9 = vsyncpa [#allocation0], 1 }

// kernel: custom-call.2
= control target key start
LH: loop header
LB: loop body
LE: loop exit
PB: predicated region body
PF: predicated region fallthrough
CT: control target
= control target key end

     0   :  { %s126_s0 = inlined_call_operand.vmem [shape: f32[2,4,16,16], index: 0, kind: input, shape index: {}]   ;;  %s127_s1 = inlined_call_operand.vmem [shape: f32[2,4,16,16], index: 1, kind: input, shape index: {}]   ;;  %s128_s2 = inlined_call_operand.hbm [shape: c64[2,4,16,16], index: 2, kind: output, shape index: {}]  }
   0x1   :  { %s87_s11 = scalar_lea.hbm %s128_s2, 2048 }
   0x2   :  { %4 = vsyncpa [#allocation0], 0  ;;  %s5_s14 = sshll.u32 %s126_s0, 4  ;;  %s6_s14 = int_to_ptr.vmem [resolvable:$true] %s5_s14 }
   0x3   :  { %s18_s15 = scalar_lea.vmem %s6_s14, 2048  ;;  %p23_p1 = scmp.lt.s32.totalorder %s6_s14, %s6_s14 }
   0x4   :  { %p19_p0 = scmp.ne.s32.totalorder %s6_s14, %s18_s15  ;;  %p24_p2 = scmp.lt.s32.totalorder %s18_s15, %s18_s15 }
   0x6   :  { %p25_p3 = por %p24_p2, %p23_p1 }
   0x8   :  { %p26_p4 = pnand %p25_p3, %p19_p0 }
   0xa   :  { %29 = shalt.err (!%p26_p4)  }
   0xb   :  { %p31_p5 = scmp.ne.s32.totalorder %s128_s2, %s87_s11  ;;  %s32_s0 = scalar_lea.hbm %s128_s2, 4096 }
   0xc   :  { %p33_p6 = scmp.lt.u32.totalorder %s32_s0, %s87_s11  ;;  %p34_p7 = scmp.lt.u32.totalorder %s87_s11, %s128_s2 }
   0xe   :  { %p35_p8 = por %p34_p7, %p33_p6 }
  0x10   :  { %p36_p9 = pnand %p35_p8, %p31_p5 }
  0x12   :  { %39 = shalt.err (!%p36_p9)  }
  0x13   :  { %8 = dma.vmem_to_hbm [thread:$0]  %s6_s14, 2048, %s128_s2, [#allocation0] }
  0x14   :  { %65 = dma.done.wait [#allocation0], 2048  }
  0x15   :  { %66 = vsyncadd [#allocation0], 4294965248 }
  0x16   :  { %10 = vsyncpa [#allocation0], 1 }
  0x17   :  { %11 = vsyncpa [#allocation1], 0  ;;  %s12_s28 = sshll.u32 %s127_s1, 4  ;;  %s13_s28 = int_to_ptr.vmem [resolvable:$true] %s12_s28 }
  0x18   :  { %s40_s29 = scalar_lea.vmem %s13_s28, 2048  ;;  %p45_p11 = scmp.lt.s32.totalorder %s13_s28, %s13_s28 }
  0x19   :  { %p41_p10 = scmp.ne.s32.totalorder %s13_s28, %s40_s29  ;;  %p46_p12 = scmp.lt.s32.totalorder %s40_s29, %s40_s29 }
  0x1b   :  { %p47_p13 = por %p46_p12, %p45_p11 }
  0x1d   :  { %p48_p0 = pnand %p47_p13, %p41_p10 }
  0x1f   :  { %51 = shalt.err (!%p48_p0)  }
  0x20   :  { %p53_p1 = scmp.ne.s32.totalorder %s87_s11, %s32_s0  ;;  %p56_p2 = scmp.lt.u32.totalorder %s32_s0, %s32_s0 }
  0x22   :  { %p57_p3 = por %p56_p2, %p34_p7 }
  0x24   :  { %p59_p4 = por %p57_p3, %p33_p6 }
  0x26   :  { %p60_p5 = pnand %p59_p4, %p53_p1 }
  0x28   :  { %63 = shalt.err (!%p60_p5)  }
  0x29   :  { %15 = dma.vmem_to_hbm [thread:$0]  %s13_s28, 2048, %s87_s11, [#allocation1] }
  0x2a   :  { %67 = dma.done.wait [#allocation1], 2048  }
  0x2b   :  { %68 = vsyncadd [#allocation1], 4294965248 }
  0x2c   :  { %17 = vsyncpa [#allocation1], 1 }

// kernel: iq_imbalance_compensation.1
= control target key start
LH: loop header
LB: loop body
LE: loop exit
PB: predicated region body
PF: predicated region fallthrough
CT: control target
= control target key end

     0   :  { %s72_s0 = inlined_call_operand.vmem [shape: f32[2,2,1024], index: 0, kind: input, shape index: {}, may-alias: {0,1}]   ;;  %s73_s1 = inlined_call_operand.vmem [shape: f32[2,2,1024], index: 1, kind: output, shape index: {}, may-alias: {0,1}]  }
   0x1   :  { %v8_v0 = vld [vmem:[%s72_s0] sm:$0xff]  ;;  %v34_v1 = vld [vmem:[%s72_s0 + $0x10] sm:$0xff]  ;;  %v9_v2 = vld [vmem:[%s72_s0 + $0x8] sm:$0xff] }
   0x2   :  { %v13_v3 = vmul.f32 0.7946914, %v8_v0  ;;  %v15_v4 = vmul.f32 0.02356449, %v34_v1  ;;  %v21_v5 = vmul.f32 0.013871389, %v8_v0 }
   0x3   :  { %v35_v6 = vld [vmem:[%s72_s0 + $0x18] sm:$0xff]  ;;  %v14_v7 = vmul.f32 0.7946914, %v9_v2  ;;  %v22_v8 = vmul.f32 0.013871389, %v9_v2 }
   0x4   :  { %v17_v9 = vadd.f32 %v15_v4, %v13_v3  ;;  %v16_v10 = vmul.f32 0.02356449, %v35_v6  ;;  %v23_v11 = vmul.f32 1.3500087, %v34_v1  ;;  %v24_v12 = vmul.f32 1.3500087, %v35_v6 }
   0x6   :  { %19 = vst [vmem:[%s73_s1] sm:$0xff] %v17_v9  ;;  %v18_v13 = vadd.f32 %v16_v10, %v14_v7  ;;  %v25_v14 = vadd.f32 %v23_v11, %v21_v5  ;;  %v26_v15 = vadd.f32 %v24_v12, %v22_v8 }
   0x8   :  { %20 = vst [vmem:[%s73_s1 + $0x8] sm:$0xff] %v18_v13  ;;  %36 = vst [vmem:[%s73_s1 + $0x10] sm:$0xff] %v25_v14 }
   0x9   :  { %37 = vst [vmem:[%s73_s1 + $0x18] sm:$0xff] %v26_v15 }

</bundles_post_ra>
